<compile_context>
chip_gen: v7x
topology: tpu7x:2x2x1
jax: 0.10.0
libtpu: 0.0.40
codegen_flags: <defaults>
</compile_context>

<pallas_src>
import functools

import numpy as np
import jax
import jax.numpy as jnp
from jax.experimental import pallas as pl
from jax.experimental.pallas import tpu as pltpu


def _dynconv_kernel(q_ref, wproj_ref, bproj_ref, x_ref, sel_ref, g_ref, cbias_ref,
                    out_ref, xpad_ref, *, K, T, padding_l, weight_softmax):
    # q_ref:     (1, T, Cq)       query rows for this batch (resident across the C-tile axis)
    # wproj_ref: (Cq, HKp)        this C-tile's filter-generating weights (bf16)
    # bproj_ref: (1, 1, HKp)      this C-tile's filter-generating bias (f32)
    # x_ref:     (1, T, Ct)       this (batch, C-tile) input slab
    # sel_ref:   (K, HKp, Ct)     per-tap head->lane broadcast selectors, 0/1 in bf16 (resident)
    # g_ref:     (HKp, HKp)       block-diagonal ones (sum-within-head) + identity on padding (resident)
    # cbias_ref: (1, Ct)          conv bias slice (f32)
    # out_ref:   (1, T, Ct)
    # xpad_ref:  (Tp8, Ct)        VMEM scratch holding the zero-haloed input slab

    # ---- dynamic filter generation: one bf16 MXU matmul for all heads of this tile ----
    q = q_ref[0].astype(jnp.bfloat16)                                         # (T, Cq)
    logits = jnp.dot(q, wproj_ref[...],
                     preferred_element_type=jnp.float32) + bproj_ref[0]       # (T, HKp) f32

    if weight_softmax:
        g = g_ref[...]                                                        # (HKp, HKp) f32
        # Per-head stabilisation: subtract the per-head mean (softmax shift-invariant).
        # The head's own max logit is >= its mean, so the denominator is always >= 1
        # (no Inf/NaN even when one head's logits dwarf another's).
        center = jnp.dot(logits, g, preferred_element_type=jnp.float32) * (1.0 / K)
        e = jnp.exp(logits - center)
        denom = jnp.dot(e, g, preferred_element_type=jnp.float32)             # per-head sum, >= 1
        w = e * pl.reciprocal(denom, approx=True)
    else:
        w = logits
    # TODO(synk): weight_dropout (DropConnect) omitted — eval mode (identity).
    w = w.astype(jnp.bfloat16)                                                # (T, HKp)

    # ---- stage x into the zero-haloed scratch (halo handled in VMEM, no host-side pad) ----
    t_pad, ct = xpad_ref.shape
    if padding_l > 0:
        xpad_ref[0:padding_l, :] = jnp.zeros((padding_l, ct), xpad_ref.dtype)
    tail = t_pad - (padding_l + T)
    if tail > 0:
        xpad_ref[padding_l + T:t_pad, :] = jnp.zeros((tail, ct), xpad_ref.dtype)
    xpad_ref[padding_l:padding_l + T, :] = x_ref[0]

    # ---- direct K-tap shift-and-FMA ----
    #   W_k[t, h*R + r] = w[t, h*K + k]   (bf16 0/1 selector matmul -> lane broadcast)
    #   out[t, :]      += W_k[t, :] * x_halo[t + k, :]
    # Per-tap shifted windows are read from the scratch REF (no value-slice relayouts).
    acc = None
    for k in range(K):                                                        # K is small & static
        wk = jnp.dot(w, sel_ref[k], preferred_element_type=jnp.float32)       # (T, Ct) f32
        xk = xpad_ref[k:k + T, :].astype(jnp.float32)
        acc = wk * xk if acc is None else acc + wk * xk

    out_ref[0] = (acc + cbias_ref[...]).astype(out_ref.dtype)


def _choose_heads_per_tile(H, R, target_lanes=512):
    """Largest head group whose channel span is <= target_lanes and lane-aligned (or full C)."""
    if H * R <= target_lanes:
        return H
    for hpt in range(H, 0, -1):
        if H % hpt:
            continue
        ct = hpt * R
        if ct <= target_lanes and ct % 128 == 0:
            return hpt
    return H          # fallback: single tile over the full channel dim


def dynamic_conv1d_tbc(x, query, proj_w, proj_b, conv_bias, *,
                       kernel_size, padding_l, num_heads, weight_softmax=True):
    """Forward of DynamicConv1dTBC (expanded path, eval mode).

    x:         (T, B, C)
    query:     (T, B, Cq)
    proj_w:    (Cq, H*K)  — Linear expressed so `query @ proj_w + proj_b` gives the filters
                             (columns in head-major (h*K + k) order, matching fairseq)
    proj_b:    (H*K,)
    conv_bias: (C,) or None
    returns (T, B, C)
    """
    T, B, C = x.shape
    Cq = query.shape[-1]
    H, K = num_heads, kernel_size
    R = C // H
    assert R * H == C
    assert 0 <= padding_l <= K - 1, "expanded path requires 0 <= padding_l <= K - 1"
    # TODO(synk): K > T with padding_l == K - 1 (fairseq's weight re-narrowing) not handled.
    assert not (K > T and padding_l == K - 1)

    # ---- head-group (channel) tiling ----
    hpt = _choose_heads_per_tile(H, R)
    nct = H // hpt                                    # number of C tiles
    Ct = hpt * R                                      # lanes per tile (multiple of 128, or == C)
    HKt = hpt * K                                     # real filter columns per tile
    HKp = ((HKt + 127) // 128) * 128                  # padded to full-lane vregs
    Tp8 = ((T + K - 1 + 7) // 8) * 8                  # scratch rows (halo + sublane round-up)

    # ---- host-side parameter re-layout (tiny one-time work; NOT the activation pad) ----
    pw = proj_w.reshape(Cq, nct, HKt)
    pw = jnp.pad(pw, ((0, 0), (0, 0), (0, HKp - HKt)))
    pw = pw.reshape(Cq, nct * HKp).astype(jnp.bfloat16)                      # (Cq, nct*HKp)
    pb = proj_b.reshape(nct, 1, HKt)
    pb = jnp.pad(pb, ((0, 0), (0, 0), (0, HKp - HKt))).astype(jnp.float32)   # (nct, 1, HKp)
    if conv_bias is None:
        cb = jnp.zeros((1, C), jnp.float32)
    else:
        cb = conv_bias.reshape(1, C).astype(jnp.float32)

    # Selector: sel[k, hh*K + k, hh*R:(hh+1)*R] = 1 (same pattern for every C tile); bf16 is exact.
    sel_np = np.zeros((K, HKp, Ct), np.float32)
    for k in range(K):
        for hh in range(hpt):
            sel_np[k, hh * K + k, hh * R:(hh + 1) * R] = 1.0
    sel = jnp.asarray(sel_np, dtype=jnp.bfloat16)
    # G: block-diagonal ones over each head's K columns; identity on the padded columns so the
    # padded softmax denominators are 1 (never 0 -> no Inf entering the selector matmul).
    g_np = np.zeros((HKp, HKp), np.float32)
    g_np[:HKt, :HKt] = np.kron(np.eye(hpt, dtype=np.float32), np.ones((K, K), np.float32))
    for p in range(HKt, HKp):
        g_np[p, p] = 1.0
    g = jnp.asarray(g_np)

    # Batch-major re-layout (TODO(synk): avoidable if the surrounding model is batch-major).
    q_b = jnp.transpose(query, (1, 0, 2))             # (B, T, Cq)
    x_b = jnp.transpose(x, (1, 0, 2))                 # (B, T, C)

    # ---- explicit VMEM budget (v5e default scoped limit is only 16 MiB) ----
    xi, qi = x.dtype.itemsize, query.dtype.itemsize
    est = (2 * (T * Cq * qi + 2 * T * Ct * xi + Cq * HKp * 2)    # double-buffered q/x/out/proj_w
           + K * HKp * Ct * 2 + HKp * HKp * 4                    # resident sel + G
           + Tp8 * Ct * xi                                       # halo scratch
           + 6 * T * HKp * 4 + 4 * T * Ct * 4)                   # in-kernel temporaries
    vmem_limit = int(min(max(2 * est, 32 * 1024 * 1024), 100 * 1024 * 1024))

    kernel = functools.partial(_dynconv_kernel, K=K, T=T, padding_l=padding_l,
                               weight_softmax=weight_softmax)

    out_b = pl.pallas_call(
        kernel,
        out_shape=jax.ShapeDtypeStruct((B, T, C), x.dtype),
        grid_spec=pltpu.PrefetchScalarGridSpec(
            num_scalar_prefetch=0,
            grid=(B, nct),
            in_specs=[
                pl.BlockSpec((1, T, Cq), lambda i, j: (i, 0, 0)),    # query (resident over j)
                pl.BlockSpec((Cq, HKp), lambda i, j: (0, j)),        # proj_w tile (bf16)
                pl.BlockSpec((1, 1, HKp), lambda i, j: (j, 0, 0)),   # proj_b tile
                pl.BlockSpec((1, T, Ct), lambda i, j: (i, 0, j)),    # x tile
                pl.BlockSpec((K, HKp, Ct), lambda i, j: (0, 0, 0)),  # tap selectors (resident)
                pl.BlockSpec((HKp, HKp), lambda i, j: (0, 0)),       # head-group matrix (resident)
                pl.BlockSpec((1, Ct), lambda i, j: (0, j)),          # conv bias tile
            ],
            out_specs=pl.BlockSpec((1, T, Ct), lambda i, j: (i, 0, j)),
            scratch_shapes=[pltpu.VMEM((Tp8, Ct), x.dtype)],         # zero-haloed x slab
        ),
        compiler_params=pltpu.CompilerParams(
            dimension_semantics=("parallel", "parallel"),
            vmem_limit_bytes=vmem_limit,
        ),
    )(q_b, pw, pb, x_b, sel, g, cb)

    return jnp.transpose(out_b, (1, 0, 2))             # (T, B, C)


def _reference(x, query, proj_w, proj_b, conv_bias, *,
               kernel_size, padding_l, num_heads, weight_softmax):
    """Pure-JAX f32 reference mirroring fairseq's _forward_expanded semantics."""
    T, B, C = x.shape
    H, K = num_heads, kernel_size
    R = C // H
    w = jnp.einsum('tbc,ck->tbk', query, proj_w) + proj_b        # (T, B, H*K)
    w = w.reshape(T, B, H, K)
    if weight_softmax:
        w = jax.nn.softmax(w, axis=-1)
    xr = x.reshape(T, B, H, R)
    right = K - 1 - padding_l
    x_pad = jnp.pad(xr, ((padding_l, max(right, 0)), (0, 0), (0, 0), (0, 0)))
    out = jnp.zeros((T, B, H, R), jnp.float32)
    for k in range(K):
        out = out + w[..., k:k + 1] * x_pad[k:k + T]
    out = out.reshape(T, B, C)
    if conv_bias is not None:
        out = out + conv_bias.reshape(1, 1, C)
    return out


if __name__ == "__main__":
    # Small config consistent with the module: T x B x C input, H heads, K-tap filters.
    T, B, C = 8, 2, 32
    H, K = 4, 3
    padding_l = K // 2           # "same" padding
    Cq = C                       # query_size defaults to input_size
    weight_softmax = True

    key = jax.random.PRNGKey(0)
    kx, kq, kw, kb, kc = jax.random.split(key, 5)
    x = jax.random.normal(kx, (T, B, C), dtype=jnp.float32)
    query = x                                                        # query defaults to x
    proj_w = 0.1 * jax.random.normal(kw, (Cq, H * K), dtype=jnp.float32)
    proj_b = 0.01 * jax.random.normal(kb, (H * K,), dtype=jnp.float32)
    conv_bias = 0.1 * jax.random.normal(kc, (C,), dtype=jnp.float32)

    out = dynamic_conv1d_tbc(x, query, proj_w, proj_b, conv_bias,
                             kernel_size=K, padding_l=padding_l,
                             num_heads=H, weight_softmax=weight_softmax)
    out = jax.block_until_ready(out)

    ref = _reference(x, query, proj_w, proj_b, conv_bias,
                     kernel_size=K, padding_l=padding_l,
                     num_heads=H, weight_softmax=weight_softmax)

    assert out.shape == (T, B, C)
    # bf16 MXU matmuls + approx reciprocal => compare against the f32 reference at bf16-level tol.
    max_err = float(jnp.max(jnp.abs(out - ref)))
    assert jnp.allclose(out, ref, atol=5e-2, rtol=5e-2), max_err
    print("KERNEL_OK")
</pallas_src>

<mosaic_0001>
module attributes {stable_mosaic.version = 11 : i64} {
  func.func @_dynconv_kernel(%arg0: i32, %arg1: i32, %arg2: memref<1x8x32xf32, #tpu.memory_space<vmem>>, %arg3: memref<32x128xbf16, #tpu.memory_space<vmem>>, %arg4: memref<1x1x128xf32, #tpu.memory_space<vmem>>, %arg5: memref<1x8x32xf32, #tpu.memory_space<vmem>>, %arg6: memref<3x128x32xbf16, #tpu.memory_space<vmem>>, %arg7: memref<128x128xf32, #tpu.memory_space<vmem>>, %arg8: memref<1x32xf32, #tpu.memory_space<vmem>>, %arg9: memref<1x8x32xf32, #tpu.memory_space<vmem>>, %arg10: memref<16x32xf32, #tpu.memory_space<vmem>>) attributes {dimension_semantics = [#tpu.dimension_semantics<parallel>, #tpu.dimension_semantics<parallel>], iteration_bounds = array<i64: 2, 1>, scalar_prefetch = 0 : i64, scratch_operands = 1 : i64, tpu.core_type = #tpu.core_type<tc>, window_params = [{transform_indices = @transform_0, window_bounds = array<i64: 1, 8, 32>}, {transform_indices = @transform_1, window_bounds = array<i64: 32, 128>}, {transform_indices = @transform_2, window_bounds = array<i64: 1, 1, 128>}, {transform_indices = @transform_3, window_bounds = array<i64: 1, 8, 32>}, {pipeline_mode = #tpu.pipeline_mode<synchronous>, transform_indices = @transform_4, window_bounds = array<i64: 3, 128, 32>}, {pipeline_mode = #tpu.pipeline_mode<synchronous>, transform_indices = @transform_5, window_bounds = array<i64: 128, 128>}, {transform_indices = @transform_6, window_bounds = array<i64: 1, 32>}, {transform_indices = @transform_7, window_bounds = array<i64: 1, 8, 32>}]} {
    %c0 = arith.constant 0 : index
    %c0_0 = arith.constant 0 : index
    %c0_1 = arith.constant 0 : index
    %0 = vector.load %arg2[%c0, %c0_0, %c0_1] : memref<1x8x32xf32, #tpu.memory_space<vmem>>, vector<1x8x32xf32>
    %1 = vector.shape_cast %0 : vector<1x8x32xf32> to vector<8x32xf32>
    %2 = arith.truncf %1 : vector<8x32xf32> to vector<8x32xbf16>
    %c0_2 = arith.constant 0 : index
    %c0_3 = arith.constant 0 : index
    %3 = vector.load %arg3[%c0_2, %c0_3] : memref<32x128xbf16, #tpu.memory_space<vmem>>, vector<32x128xbf16>
    %cst = arith.constant dense<0.000000e+00> : vector<8x128xf32>
    %4 = tpu.matmul %2, %3, %cst {dimension_numbers = #tpu.dot_dimension_numbers<[1], [0], [0], [1], [0, 0, 1, 1], [], []>} : vector<8x32xbf16>, vector<32x128xbf16>, vector<8x128xf32> -> vector<8x128xf32>
    %c0_4 = arith.constant 0 : index
    %c0_5 = arith.constant 0 : index
    %c0_6 = arith.constant 0 : index
    %5 = vector.load %arg4[%c0_4, %c0_5, %c0_6] : memref<1x1x128xf32, #tpu.memory_space<vmem>>, vector<1x1x128xf32>
    %6 = vector.shape_cast %5 : vector<1x1x128xf32> to vector<1x128xf32>
    %7 = vector.broadcast %6 : vector<1x128xf32> to vector<8x128xf32>
    %8 = arith.addf %4, %7 : vector<8x128xf32>
    %c0_7 = arith.constant 0 : index
    %c0_8 = arith.constant 0 : index
    %9 = vector.load %arg7[%c0_7, %c0_8] : memref<128x128xf32, #tpu.memory_space<vmem>>, vector<128x128xf32>
    %cst_9 = arith.constant dense<0.000000e+00> : vector<8x128xf32>
    %10 = tpu.matmul %8, %9, %cst_9 {dimension_numbers = #tpu.dot_dimension_numbers<[1], [0], [0], [1], [0, 0, 1, 1], [], []>} : vector<8x128xf32>, vector<128x128xf32>, vector<8x128xf32> -> vector<8x128xf32>
    %cst_10 = arith.constant 0.333333343 : f32
    %11 = vector.broadcast %cst_10 : f32 to vector<8x128xf32>
    %12 = arith.mulf %10, %11 : vector<8x128xf32>
    %13 = arith.subf %8, %12 : vector<8x128xf32>
    %14 = math.exp %13 : vector<8x128xf32>
    %cst_11 = arith.constant dense<0.000000e+00> : vector<8x128xf32>
    %15 = tpu.matmul %14, %9, %cst_11 {dimension_numbers = #tpu.dot_dimension_numbers<[1], [0], [0], [1], [0, 0, 1, 1], [], []>} : vector<8x128xf32>, vector<128x128xf32>, vector<8x128xf32> -> vector<8x128xf32>
    %16 = tpu.reciprocal %15 {approx = true} : vector<8x128xf32> -> vector<8x128xf32>
    %17 = arith.mulf %14, %16 : vector<8x128xf32>
    %18 = arith.truncf %17 : vector<8x128xf32> to vector<8x128xbf16>
    %cst_12 = arith.constant 0.000000e+00 : f32
    %19 = vector.broadcast %cst_12 : f32 to vector<1x32xf32>
    %c0_13 = arith.constant 0 : index
    %c0_14 = arith.constant 0 : index
    %20 = vector.load %arg10[%c0_13, %c0_14] : memref<16x32xf32, #tpu.memory_space<vmem>>, vector<1x32xf32>
    tpu.vector_store %arg10[%c0_13, %c0_14], %19 {strides = array<i32>} : memref<16x32xf32, #tpu.memory_space<vmem>>, vector<1x32xf32>,
    %cst_15 = arith.constant 0.000000e+00 : f32
    %21 = vector.broadcast %cst_15 : f32 to vector<7x32xf32>
    %c9 = arith.constant 9 : index
    %c0_16 = arith.constant 0 : index
    %22 = vector.load %arg10[%c9, %c0_16] : memref<16x32xf32, #tpu.memory_space<vmem>>, vector<7x32xf32>
    tpu.vector_store %arg10[%c9, %c0_16], %21 {strides = array<i32>} : memref<16x32xf32, #tpu.memory_space<vmem>>, vector<7x32xf32>,
    %c0_17 = arith.constant 0 : index
    %c0_18 = arith.constant 0 : index
    %c0_19 = arith.constant 0 : index
    %23 = vector.load %arg5[%c0_17, %c0_18, %c0_19] : memref<1x8x32xf32, #tpu.memory_space<vmem>>, vector<1x8x32xf32>
    %24 = vector.shape_cast %23 : vector<1x8x32xf32> to vector<8x32xf32>
    %c1 = arith.constant 1 : index
    %c0_20 = arith.constant 0 : index
    %25 = vector.load %arg10[%c1, %c0_20] : memref<16x32xf32, #tpu.memory_space<vmem>>, vector<8x32xf32>
    tpu.vector_store %arg10[%c1, %c0_20], %24 {strides = array<i32>} : memref<16x32xf32, #tpu.memory_space<vmem>>, vector<8x32xf32>,
    %c0_21 = arith.constant 0 : index
    %c0_22 = arith.constant 0 : index
    %c0_23 = arith.constant 0 : index
    %26 = vector.load %arg6[%c0_21, %c0_22, %c0_23] : memref<3x128x32xbf16, #tpu.memory_space<vmem>>, vector<1x128x32xbf16>
    %27 = vector.shape_cast %26 : vector<1x128x32xbf16> to vector<128x32xbf16>
    %cst_24 = arith.constant dense<0.000000e+00> : vector<8x32xf32>
    %28 = tpu.matmul %18, %27, %cst_24 {dimension_numbers = #tpu.dot_dimension_numbers<[1], [0], [0], [1], [0, 0, 1, 1], [], []>} : vector<8x128xbf16>, vector<128x32xbf16>, vector<8x32xf32> -> vector<8x32xf32>
    %c0_25 = arith.constant 0 : index
    %c0_26 = arith.constant 0 : index
    %29 = vector.load %arg10[%c0_25, %c0_26] : memref<16x32xf32, #tpu.memory_space<vmem>>, vector<8x32xf32>
    %30 = arith.mulf %28, %29 : vector<8x32xf32>
    %c1_27 = arith.constant 1 : index
    %c0_28 = arith.constant 0 : index
    %c0_29 = arith.constant 0 : index
    %31 = vector.load %arg6[%c1_27, %c0_28, %c0_29] : memref<3x128x32xbf16, #tpu.memory_space<vmem>>, vector<1x128x32xbf16>
    %32 = vector.shape_cast %31 : vector<1x128x32xbf16> to vector<128x32xbf16>
    %cst_30 = arith.constant dense<0.000000e+00> : vector<8x32xf32>
    %33 = tpu.matmul %18, %32, %cst_30 {dimension_numbers = #tpu.dot_dimension_numbers<[1], [0], [0], [1], [0, 0, 1, 1], [], []>} : vector<8x128xbf16>, vector<128x32xbf16>, vector<8x32xf32> -> vector<8x32xf32>
    %c1_31 = arith.constant 1 : index
    %c0_32 = arith.constant 0 : index
    %34 = vector.load %arg10[%c1_31, %c0_32] : memref<16x32xf32, #tpu.memory_space<vmem>>, vector<8x32xf32>
    %35 = arith.mulf %33, %34 : vector<8x32xf32>
    %36 = arith.addf %30, %35 : vector<8x32xf32>
    %c2 = arith.constant 2 : index
    %c0_33 = arith.constant 0 : index
    %c0_34 = arith.constant 0 : index
    %37 = vector.load %arg6[%c2, %c0_33, %c0_34] : memref<3x128x32xbf16, #tpu.memory_space<vmem>>, vector<1x128x32xbf16>
    %38 = vector.shape_cast %37 : vector<1x128x32xbf16> to vector<128x32xbf16>
    %cst_35 = arith.constant dense<0.000000e+00> : vector<8x32xf32>
    %39 = tpu.matmul %18, %38, %cst_35 {dimension_numbers = #tpu.dot_dimension_numbers<[1], [0], [0], [1], [0, 0, 1, 1], [], []>} : vector<8x128xbf16>, vector<128x32xbf16>, vector<8x32xf32> -> vector<8x32xf32>
    %c2_36 = arith.constant 2 : index
    %c0_37 = arith.constant 0 : index
    %40 = vector.load %arg10[%c2_36, %c0_37] : memref<16x32xf32, #tpu.memory_space<vmem>>, vector<8x32xf32>
    %41 = arith.mulf %39, %40 : vector<8x32xf32>
    %42 = arith.addf %36, %41 : vector<8x32xf32>
    %c0_38 = arith.constant 0 : index
    %c0_39 = arith.constant 0 : index
    %43 = vector.load %arg8[%c0_38, %c0_39] : memref<1x32xf32, #tpu.memory_space<vmem>>, vector<1x32xf32>
    %44 = vector.broadcast %43 : vector<1x32xf32> to vector<8x32xf32>
    %45 = arith.addf %42, %44 : vector<8x32xf32>
    %c0_40 = arith.constant 0 : index
    %c0_41 = arith.constant 0 : index
    %c0_42 = arith.constant 0 : index
    %46 = vector.load %arg9[%c0_40, %c0_41, %c0_42] : memref<1x8x32xf32, #tpu.memory_space<vmem>>, vector<1x8x32xf32>
    %47 = vector.shape_cast %46 : vector<1x8x32xf32> to vector<8x32xf32>
    %48 = vector.shape_cast %45 : vector<8x32xf32> to vector<1x8x32xf32>
    tpu.vector_store %arg9[%c0_40, %c0_41, %c0_42], %48 {strides = array<i32>} : memref<1x8x32xf32, #tpu.memory_space<vmem>>, vector<1x8x32xf32>,
    return
  }
  func.func @transform_0(%arg0: i32, %arg1: i32) -> (i32, i32, i32) {
    %c0_i32 = arith.constant 0 : i32
    %c0_i32_0 = arith.constant 0 : i32
    %c0_i32_1 = arith.constant 0 : i32
    return %arg0, %c0_i32, %c0_i32_0 : i32, i32, i32
  }
  func.func @transform_1(%arg0: i32, %arg1: i32) -> (i32, i32) {
    %c0_i32 = arith.constant 0 : i32
    %c0_i32_0 = arith.constant 0 : i32
    return %c0_i32, %arg1 : i32, i32
  }
  func.func @transform_2(%arg0: i32, %arg1: i32) -> (i32, i32, i32) {
    %c0_i32 = arith.constant 0 : i32
    %c0_i32_0 = arith.constant 0 : i32
    %c0_i32_1 = arith.constant 0 : i32
    return %arg1, %c0_i32, %c0_i32_0 : i32, i32, i32
  }
  func.func @transform_3(%arg0: i32, %arg1: i32) -> (i32, i32, i32) {
    %c0_i32 = arith.constant 0 : i32
    %c0_i32_0 = arith.constant 0 : i32
    return %arg0, %c0_i32, %arg1 : i32, i32, i32
  }
  func.func @transform_4(%arg0: i32, %arg1: i32) -> (i32, i32, i32) {
    %c0_i32 = arith.constant 0 : i32
    %c0_i32_0 = arith.constant 0 : i32
    %c0_i32_1 = arith.constant 0 : i32
    %c0_i32_2 = arith.constant 0 : i32
    return %c0_i32, %c0_i32_0, %c0_i32_1 : i32, i32, i32
  }
  func.func @transform_5(%arg0: i32, %arg1: i32) -> (i32, i32) {
    %c0_i32 = arith.constant 0 : i32
    %c0_i32_0 = arith.constant 0 : i32
    %c0_i32_1 = arith.constant 0 : i32
    return %c0_i32, %c0_i32_0 : i32, i32
  }
  func.func @transform_6(%arg0: i32, %arg1: i32) -> (i32, i32) {
    %c0_i32 = arith.constant 0 : i32
    %c0_i32_0 = arith.constant 0 : i32
    return %c0_i32, %arg1 : i32, i32
  }
  func.func @transform_7(%arg0: i32, %arg1: i32) -> (i32, i32, i32) {
    %c0_i32 = arith.constant 0 : i32
    %c0_i32_0 = arith.constant 0 : i32
    return %arg0, %c0_i32, %arg1 : i32, i32, i32
  }
}

</mosaic_0001>

<bundles_post_ra>
// kernel: tpu_custom_call.1
= control target key start
LH: loop header
LB: loop body
LE: loop exit
PB: predicated region body
PF: predicated region fallthrough
CT: control target
= control target key end

     0   :  { %12 = vsyncpa [#allocation4], 0  ;;  %s1896_s0 = inlined_call_operand.vmem [shape: f32[2,8,32], index: 0, kind: input, shape index: {}]   ;;  %s1897_s1 = inlined_call_operand.vmem [shape: bf16[32,128], index: 1, kind: input, shape index: {}]   ;;  %s1898_s2 = inlined_call_operand.vmem [shape: f32[1,1,128], index: 2, kind: input, shape index: {}]   ;;  %s1899_s3 = inlined_call_operand.vmem [shape: f32[2,8,32], index: 3, kind: input, shape index: {}]   ;;  %s1900_s4 = inlined_call_operand.vmem [shape: bf16[3,128,32], index: 4, kind: input, shape index: {}]   ;;  %s1901_s5 = inlined_call_operand.vmem [shape: f32[128,128], index: 5, kind: input, shape index: {}]   ;;  %s1902_s6 = inlined_call_operand.vmem [shape: f32[1,32], index: 6, kind: input, shape index: {}]   ;;  %s1903_s7 = inlined_call_operand.hbm [shape: f32[2,8,32], index: 7, kind: output, shape index: {}]  }
   0x1   :  { %14 = vsyncpa [#allocation4 + $0x1], 0  ;;  %s1606_s24 = smov 0   ;;  %s1608_s25 = smov 0  }
   0x2   :  { %s1610_s26 = smov 0   ;;  %s1612_s27 = smov 0  }
   0x3   :  { %s1614_s28 = smov 0   ;;  %s1616_s29 = smov 0  }
   0x4 LB: > { %s1068_s30 = sadd.s32 4294967295, %s1560_s29   ;;  %s1069_s8 = sadd.s32 4294967294, %s1560_s29   ;;  %s1560_s29 = sphi %s1616_s29, %s20_s29   ;;  %s1556_s28 = sphi %s1614_s28, %s1910_s28   ;;  %s1552_s27 = sphi %s1612_s27, %s1909_s27   ;;  %s1548_s26 = sphi %s1610_s26, %s1908_s26   ;;  %s1544_s25 = sphi %s1608_s25, %s1907_s25   ;;  %s1540_s24 = sphi %s1606_s24, %s1906_s24  }
   0x5   : > { %s32_s9 = sadd.s32 1, %s1556_s28  ;;  %s215_s10 = sadd.s32 1, %s1548_s26 }
   0x6   : > { %p34_p0 = scmp.ge.s32.totalorder %s32_s9, 2  ;;  %p225_p1 = scmp.ne.s32.totalorder %s1548_s26, %s1544_s25 }
   0x7   : > { %p226_p2 = scmp.eq.s32.totalorder %s1068_s30, 1  ;;  %p231_p3 = scmp.ne.s32.totalorder %s1544_s25, %s1540_s24 }
   0x8   : > { %s1912_s9 = smov (%p34_p0, %s32_s9), 0  ;;  %p232_p5 = scmp.eq.s32.totalorder %s1069_s8, 1 }
   0x9   : > { %p1646_p4 = por %p226_p2, %p225_p1  ;;  %s210_s12 = ssub.s32 %s1556_s28, %s1912_s9 }
   0xa   : > { %p1075_p6 = scmp.ge.s32.totalorder %s1560_s29, 1  ;;  %p213_p7 = scmp.eq.s32.totalorder %s210_s12, 0 }
   0xb   : > { %p1653_p8 = por %p232_p5, %p231_p3  ;;  %p292_p9 = scmp.lt.s32.totalorder %s1560_s29, 3 }
   0xc   : > { %s1659_s14 = scalar_select %p213_p7, %s1548_s26, %s215_s10  }
   0xd   : > { %p293_p10 = pnand %p1075_p6, %p292_p9 }
   0xe   : > { %v1452_v0 = vld [vmem:[%s1897_s1] sm:$0xff] (!%p293_p10)   ;;  %v1562_v1 = vmov (!%p293_p10), 0.0   ;;  %v1453_v2 = vld [vmem:[%s1897_s1 + $0x8] sm:$0xff] (!%p293_p10)   ;;  %vm1563_vm0 = vmmov (!%p293_p10), 0   ;;  %p340_p11 = scmp.lt.s32.totalorder (!%p293_p10), %s1552_s27, 1  ;;  %v433_v5 = vld [vmem:[%s1901_s5 + $0x10] sm:$0xff] (!%p293_p10) }
   0xf   : > { %296 = sbr.rel (%p293_p10) target bundleno = 963 (0x3c3), region = 48  ;;  %1208 = vmatprep.subr.bf16.mxu0 (!%p293_p10), %v1562_v1  ;;  %1212 = vmatprep.mubr.msk.bf16.mxu0 (!%p293_p10), %vm1563_vm0, %v1562_v1  ;;  %v431_v3 = vld [vmem:[%s1901_s5] sm:$0xff] (!%p293_p10)  ;;  %v432_v4 = vld [vmem:[%s1901_s5 + $0x8] sm:$0xff] (!%p293_p10)  ;;  %v1564_v6 = vmov (!%p293_p10), 0.0|0.0   ;;  %v434_v8 = vld [vmem:[%s1901_s5 + $0x18] sm:$0xff] (!%p293_p10)  ;;  %vm387_vm1 = vcmask (!%p293_p10), 261120  }
  0x10   : > { %1209 = vmatpush3.bf16.msra.mxu0 (!%p293_p10), %v1452_v0  ;;  %1346 = vmatprep.subr.bf16.mxu1 (!%p293_p10), %v1564_v6  ;;  %v1347_v7 = vpack.c.bf16 (!%p293_p10), %v432_v4, %v431_v3  ;;  %v1350_v9 = vpack.c.bf16 (!%p293_p10), %v434_v8, %v433_v5  ;;  %v435_v10 = vld [vmem:[%s1901_s5 + $0x20] sm:$0xff] (!%p293_p10)  ;;  %v436_v11 = vld [vmem:[%s1901_s5 + $0x28] sm:$0xff] (!%p293_p10)  ;;  %v437_v14 = vld [vmem:[%s1901_s5 + $0x30] sm:$0xff] (!%p293_p10)  ;;  %vm594_vm2 = vcmask (!%p293_p10), 253952   ;;  %vm596_vm3 = vcmask (!%p293_p10), 260096   ;;  %s337_s18 = sand.u32 (!%p293_p10), 1, %s1544_s25  }
  0x11   : > { %1210 = vmatprep.subr.bf16.mxu0 (!%p293_p10), %v1562_v1  ;;  %1248 = vmatprep.mubr.msk.f32.mxu1 (!%p293_p10), %vm1563_vm0, %v1562_v1  ;;  %v438_v15 = vld [vmem:[%s1901_s5 + $0x38] sm:$0xff] (!%p293_p10)  ;;  %v1353_v17 = vpack.c.bf16 (!%p293_p10), %v436_v11, %v435_v10  ;;  %v439_v18 = vld [vmem:[%s1901_s5 + $0x40] sm:$0xff] (!%p293_p10)  ;;  %v440_v19 = vld [vmem:[%s1901_s5 + $0x48] sm:$0xff] (!%p293_p10)  ;;  %595 = vst.msk [vmem:[#allocation2] sm:$0x1] (!%p293_p10), %vm594_vm2, %v1562_v1  ;;  %s1076_s19 = sshll.u32 (!%p293_p10), %s337_s18, 3 }
  0x12   : > { %1348 = vmatpush3.bf16.msra.mxu1 (!%p293_p10), %v1347_v7  ;;  %v1356_v20 = vpack.c.bf16 (!%p293_p10), %v438_v15, %v437_v14  ;;  %v441_v21 = vld [vmem:[%s1901_s5 + $0x50] sm:$0xff] (!%p293_p10)  ;;  %v442_v22 = vld [vmem:[%s1901_s5 + $0x58] sm:$0xff] (!%p293_p10)  ;;  %v1359_v23 = vpack.c.bf16 (!%p293_p10), %v440_v19, %v439_v18  ;;  %v443_v24 = vld [vmem:[%s1901_s5 + $0x60] sm:$0xff] (!%p293_p10)  ;;  %597 = vst.msk [vmem:[#allocation2 + $0x9] sm:$0x7f] (!%p293_p10), %vm596_vm3, %v1562_v1  ;;  %s339_s23 = scalar_lea.vmem (!%p293_p10), [#allocation3], %s1076_s19 }
  0x13   : > { %1349 = vmatprep.subr.bf16.mxu1 (!%p293_p10), %v1564_v6  ;;  %v444_v25 = vld [vmem:[%s1901_s5 + $0x68] sm:$0xff] (!%p293_p10)  ;;  %v1362_v26 = vpack.c.bf16 (!%p293_p10), %v442_v22, %v441_v21  ;;  %v445_v28 = vld [vmem:[%s1901_s5 + $0x70] sm:$0xff] (!%p293_p10)  ;;  %v446_v29 = vld [vmem:[%s1901_s5 + $0x78] sm:$0xff] (!%p293_p10)  ;;  %s946_s30 = sshll.u32 (!%p293_p10), %s339_s23, 4  ;;  %s932_s16 = scalar_lea.sflag (!%p293_p10), [#allocation4], %s337_s18  ;;  %s1850_s30 = int_to_ptr.vmem [resolvable:$true] %s946_s30 }
  0x14   : > { %1211 = vmatpush3.bf16.msra.mxu0 (!%p293_p10), %v1453_v2  ;;  %v1365_v27 = vpack.c.bf16 (!%p293_p10), %v444_v25, %v443_v24  ;;  %v1368_v30 = vpack.c.bf16 (!%p293_p10), %v446_v29, %v445_v28  ;;  %v1079_v31 = vld [vmem:[%s1898_s2] ss:$0 sm:$0xff] (!%p293_p10)  ;;  %v1456_v38 = vld [vmem:[%s1900_s4 + $0x8] sm:$0xff] (!%p293_p10)   ;;  %v1458_v39 = vld [vmem:[%s1900_s4 + $0x10] sm:$0xff] (!%p293_p10)   ;;  %s1482_s17 = scalar_lea.vmem (!%p293_p10), %s1850_s30, 128 }
  0x15   : > { %1370 = vmatprep.subr.bf16.mxu0 (!%p293_p10), %v1564_v6  ;;  %v1454_v37 = vld [vmem:[%s1900_s4] sm:$0xff] (!%p293_p10)   ;;  %v1460_v40 = vld [vmem:[%s1900_s4 + $0x18] sm:$0xff] (!%p293_p10)   ;;  %v1457_v48 = vld [vmem:[%s1900_s4 + $0x48] sm:$0xff] (!%p293_p10)   ;;  %p1483_p12 = scmp.ne.s32.totalorder (!%p293_p10), %s1850_s30, %s1482_s17 }
  0x16   : > { %s341_s12 = scalar_select %p340_p11, %s1552_s27, 1  ;;  %1351 = vmatpush3.bf16.msra.mxu1 %v1350_v9  ;;  %v1455_v46 = vld [vmem:[%s1900_s4 + $0x40] sm:$0xff]   ;;  %v1459_v49 = vld [vmem:[%s1900_s4 + $0x50] sm:$0xff]   ;;  %v1461_v50 = vld [vmem:[%s1900_s4 + $0x58] sm:$0xff]  }
  0x17   : > { %1352 = vmatprep.subr.bf16.mxu1 %v1564_v6  ;;  %v1462_v51 = vld [vmem:[%s1900_s4 + $0x20] sm:$0xff]   ;;  %v1464_v53 = vld [vmem:[%s1900_s4 + $0x28] sm:$0xff]   ;;  %v1466_v55 = vld [vmem:[%s1900_s4 + $0x30] sm:$0xff]   ;;  %p1484_p13 = pnand %p1483_p12, %p1646_p4 }
  0x18   : > { %s1077_s15 = sshll.u32 %s341_s12, 3  ;;  %v1463_v52 = vld [vmem:[%s1900_s4 + $0x60] sm:$0xff]   ;;  %v1465_v54 = vld [vmem:[%s1900_s4 + $0x68] sm:$0xff]   ;;  %v1467_v56 = vld [vmem:[%s1900_s4 + $0x70] sm:$0xff]  }
  0x19   : > { %s343_s22 = scalar_lea.vmem %s1896_s0, %s1077_s15  ;;  %s357_s8 = scalar_lea.vmem %s1899_s3, %s1077_s15  ;;  %v1468_v57 = vld [vmem:[%s1900_s4 + $0x38] sm:$0xff]   ;;  %v1470_v63 = vld [vmem:[%s1900_s4 + $0x80] sm:$0xff]   ;;  %v1471_v2 = vld [vmem:[%s1900_s4 + $0x88] sm:$0xff]  }
  0x1a   : > { %v362_v12 = vld [vmem:[%s343_s22] sm:$0xff]  ;;  %1354 = vmatpush3.bf16.msra.mxu1 %v1353_v17  ;;  %v1469_v58 = vld [vmem:[%s1900_s4 + $0x78] sm:$0xff]   ;;  %v1472_v3 = vld [vmem:[%s1900_s4 + $0x90] sm:$0xff]   ;;  %s1141_s22 = sshll.u32 %s1552_s27, 7  ;;  %p1485_p0 = pneg %p1484_p13 }
  0x1b   : > { %v598_v13 = vld [vmem:[%s357_s8] sm:$0xff]  ;;  %v363_v16 = vpack.c.bf16 %v362_v12, %v362_v12  ;;  %1355 = vmatprep.subr.bf16.mxu1 %v1564_v6  ;;  %v1473_v4 = vld [vmem:[%s1900_s4 + $0x98] sm:$0xff]   ;;  %s1848_s12 = scalar_lea.hbm %s1903_s7, %s1141_s22  ;;  %s1565_s27 = smov [#allocation3]  }
  0x1c   : > { %599 = vst.msk [vmem:[#allocation2 + $0x1] sm:$0xff] %vm387_vm1, %v598_v13  ;;  %v1474_v5 = vld [vmem:[%s1900_s4 + $0xa0] sm:$0xff]   ;;  %v1477_v8 = vld [vmem:[%s1900_s4 + $0xb8] sm:$0xff]   ;;  %s1486_s15 = sshll.u32 %s1565_s27, 4  ;;  %s1487_s15 = int_to_ptr.vmem [resolvable:$false] %s1486_s15 }
  0x1d   : > { %1213 = vmatmul.mubr.msk.bf16.vlgmr.msra.gmra.mrb[0].mxu0 %vm387_vm1, %v363_v16  ;;  %v1139_v25 = vld [vmem:[%s1902_s6] ss:$0 sm:$0xff]  ;;  %s1488_s19 = scalar_lea.vmem %s1487_s15, 256  ;;  %p1489_p1 = scmp.lt.s32.totalorder %s1850_s30, %s1487_s15 }
  0x1e   : > { %1372 = vmatpush3.bf16.msra.mxu0 %v1347_v7  ;;  %1283 = vmatprep.mubr.msk.f32.mxu0 %vm1563_vm0, %v1562_v1  ;;  %v1476_v7 = vld [vmem:[%s1900_s4 + $0xb0] sm:$0xff]   ;;  %p1490_p2 = scmp.lt.s32.totalorder %s1488_s19, %s1482_s17 }
  0x1f   : > { %1373 = vmatprep.subr.bf16.mxu0 %v1564_v6  ;;  %1357 = vmatpush3.bf16.msra.mxu1 %v1356_v20 }
  0x20   : > { %1358 = vmatprep.subr.bf16.mxu1 %v1564_v6  ;;  %p1491_p3 = por %p1490_p2, %p1489_p1 }
  0x22   : > { %1375 = vmatpush3.bf16.msra.mxu0 %v1350_v9  ;;  %p1492_p5 = pnand %p1491_p3, %p1485_p0 }
  0x23   : > { %1376 = vmatprep.subr.bf16.mxu0 %v1564_v6  ;;  %1360 = vmatpush3.bf16.msra.mxu1 %v1359_v23  ;;  %v704_v9 = vld [vmem:[#allocation2] sm:$0xff] }
  0x24   : > { %1361 = vmatprep.subr.bf16.mxu1 %v1564_v6  ;;  %v811_v10 = vld [vmem:[#allocation2 + $0x1] sm:$0xff] }
  0x25   : > { %v919_v22 = vld [vmem:[#allocation2 + $0x2] sm:$0xff] }
  0x26   : > { %1378 = vmatpush3.bf16.msra.mxu0 %v1353_v17 }
  0x27   : > { %1379 = vmatprep.subr.bf16.mxu0 %v1564_v6  ;;  %1363 = vmatpush3.bf16.msra.mxu1 %v1362_v26 }
  0x28   : > { %1364 = vmatprep.subr.bf16.mxu1 %v1564_v6 }
  0x2a   : > { %1381 = vmatpush3.bf16.msra.mxu0 %v1356_v20 }
  0x2b   : > { %1382 = vmatprep.subr.bf16.mxu0 %v1564_v6  ;;  %1366 = vmatpush3.bf16.msra.mxu1 %v1365_v27 }
  0x2c   : > { %1367 = vmatprep.subr.bf16.mxu1 %v1564_v6 }
  0x2e   : > { %1384 = vmatpush3.bf16.msra.mxu0 %v1359_v23 }
  0x2f   : > { %1385 = vmatprep.subr.bf16.mxu0 %v1564_v6  ;;  %1369 = vmatpush3.bf16.msra.mxu1 %v1368_v30 }
  0x30   : > { %1286 = vmatprep.subr.bf16.mxu1 %v1562_v1 }
  0x32   : > { %1387 = vmatpush3.bf16.msra.mxu0 %v1362_v26 }
  0x33   : > { %1388 = vmatprep.subr.bf16.mxu0 %v1564_v6 }
  0x36   : > { %1390 = vmatpush3.bf16.msra.mxu0 %v1365_v27 }
  0x37   : > { %1391 = vmatprep.subr.bf16.mxu0 %v1564_v6  ;;  %v1475_v6 = vld [vmem:[%s1900_s4 + $0xa8] sm:$0xff]  }
  0x3a   : > { %1393 = vmatpush3.bf16.msra.mxu0 %v1368_v30 }
  0x3b   : > { %1306 = vmatprep.subr.bf16.mxu0 %v1562_v1 }
  0xf0   : > { %v425_v32 = vpop.f32.mrb[0].mxu0 }
  0xf1   : > { %v426_v33 = vadd.f32 %v1079_v31, %v425_v32  ;;  %v1214_v34 = vpop.f32.mrb[1].mxu0 }
  0xf2   : > { %v428_v35 = vpop.f32.mrb[2].mxu0 }
  0xf3   : > { %v1215_v36 = vpop.f32.mrb[3].mxu0  ;;  %1249 = vmatmul.mubr.f32.vlgmr.msra.gmra.mrb[0].mxu1 %v426_v33 }
  0xf4   : > { %1302 = vmatprep.mubr.msk.bf16.mxu1 %vm1563_vm0, %v1562_v1  ;;  %1287 = vmatpush3.bf16.msra.mxu1 %v1454_v37 }
  0xf5   : > { %1288 = vmatprep.subr.bf16.mxu1 %v1562_v1 }
  0xf8   : > { %1289 = vmatpush3.bf16.msra.mxu1 %v1456_v38 }
  0xf9   : > { %1290 = vmatprep.subr.bf16.mxu1 %v1562_v1 }
  0xfc   : > { %1291 = vmatpush3.bf16.msra.mxu1 %v1458_v39 }
  0xfd   : > { %1292 = vmatprep.subr.bf16.mxu1 %v1562_v1 }
 0x100   : > { %1293 = vmatpush3.bf16.msra.mxu1 %v1460_v40 }
 0x101   : > { %1294 = vmatprep.subr.bf16.mxu1 %v1562_v1 }
 0x104   : > { %1295 = vmatpush3.bf16.msra.mxu1 %v1462_v51 }
 0x105   : > { %1296 = vmatprep.subr.bf16.mxu1 %v1562_v1 }
 0x108   : > { %1297 = vmatpush3.bf16.msra.mxu1 %v1464_v53 }
 0x109   : > { %1298 = vmatprep.subr.bf16.mxu1 %v1562_v1 }
 0x10c   : > { %1299 = vmatpush3.bf16.msra.mxu1 %v1466_v55 }
 0x10d   : > { %1300 = vmatprep.subr.bf16.mxu1 %v1562_v1 }
 0x110   : > { %1301 = vmatpush3.bf16.msra.mxu1 %v1468_v57 }
 0x111   : > { %1326 = vmatprep.subr.bf16.mxu1 %v1562_v1 }
 0x1c6   : > { %v513_v41 = vpop.f32.mrb[0].mxu1 }
 0x1c7   : > { %v517_v42 = vmul.f32 0.33333334, %v513_v41  ;;  %v1250_v43 = vpop.f32.mrb[1].mxu1 }
 0x1c9   : > { %v518_v44 = vsub.f32 %v426_v33, %v517_v42 }
 0x1cb   : > { %v519_v45 = vmul.f32 1.442695, %v518_v44 }
 0x1cd   : > { %1478 = vpow2.f32 %v519_v45 }
 0x1d7   : > { %v1479_v47 = vpop.eup %1478 }
 0x1d8   : > { %1284 = vmatmul.mubr.f32.vlgmr.msra.gmra.mrb[4].mxu0 %v1479_v47 }
 0x1d9   : > { %1307 = vmatpush3.bf16.msra.mxu0 %v1455_v46  ;;  %1322 = vmatprep.mubr.msk.bf16.mxu0 %vm1563_vm0, %v1562_v1 }
 0x1da   : > { %1308 = vmatprep.subr.bf16.mxu0 %v1562_v1 }
 0x1dd   : > { %1309 = vmatpush3.bf16.msra.mxu0 %v1457_v48 }
 0x1de   : > { %1310 = vmatprep.subr.bf16.mxu0 %v1562_v1 }
 0x1e1   : > { %1311 = vmatpush3.bf16.msra.mxu0 %v1459_v49 }
 0x1e2   : > { %1312 = vmatprep.subr.bf16.mxu0 %v1562_v1 }
 0x1e5   : > { %1313 = vmatpush3.bf16.msra.mxu0 %v1461_v50 }
 0x1e6   : > { %1314 = vmatprep.subr.bf16.mxu0 %v1562_v1 }
 0x1e9   : > { %1315 = vmatpush3.bf16.msra.mxu0 %v1463_v52 }
 0x1ea   : > { %1316 = vmatprep.subr.bf16.mxu0 %v1562_v1 }
 0x1ed   : > { %1317 = vmatpush3.bf16.msra.mxu0 %v1465_v54 }
 0x1ee   : > { %1318 = vmatprep.subr.bf16.mxu0 %v1562_v1 }
 0x1f1   : > { %1319 = vmatpush3.bf16.msra.mxu0 %v1467_v56 }
 0x1f2   : > { %1320 = vmatprep.subr.bf16.mxu0 %v1562_v1 }
 0x1f5   : > { %1321 = vmatpush3.bf16.msra.mxu0 %v1469_v58 }
 0x2ab   : > { %v587_v59 = vpop.f32.mrb[4].mxu0 }
 0x2ac   : > { %1480 = vrcp.f32 %v587_v59  ;;  %v1285_v60 = vpop.f32.mrb[5].mxu0 }
 0x2b6   : > { %v1481_v61 = vpop.eup %1480 }
 0x2b7   : > { %v592_v62 = vmul.f32 %v1481_v61, %v1479_v47 }
 0x2b9   : > { %v593_v0 = vpack.c.bf16 %v592_v62, %v592_v62 }
 0x2bb   : > { %1303 = vmatmul.mubr.bf16.vlgmr.msra.gmra.mrb[4].mxu1 %v593_v0  ;;  %1323 = vmatmul.mubr.bf16.vlgmr.msra.gmra.mrb[8].mxu0 %v593_v0 }
 0x2bc   : > { %1327 = vmatpush3.bf16.msra.mxu1 %v1470_v63  ;;  %1342 = vmatprep.mubr.msk.bf16.mxu1 %vm1563_vm0, %v1562_v1 }
 0x2bd   : > { %1328 = vmatprep.subr.bf16.mxu1 %v1562_v1 }
 0x2c0   : > { %1329 = vmatpush3.bf16.msra.mxu1 %v1471_v2 }
 0x2c1   : > { %1330 = vmatprep.subr.bf16.mxu1 %v1562_v1 }
 0x2c4   : > { %1331 = vmatpush3.bf16.msra.mxu1 %v1472_v3 }
 0x2c5   : > { %1332 = vmatprep.subr.bf16.mxu1 %v1562_v1 }
 0x2c8   : > { %1333 = vmatpush3.bf16.msra.mxu1 %v1473_v4 }
 0x2c9   : > { %1334 = vmatprep.subr.bf16.mxu1 %v1562_v1 }
 0x2cc   : > { %1335 = vmatpush3.bf16.msra.mxu1 %v1474_v5 }
 0x2cd   : > { %1336 = vmatprep.subr.bf16.mxu1 %v1562_v1 }
 0x2d0   : > { %1337 = vmatpush3.bf16.msra.mxu1 %v1475_v6 }
 0x2d1   : > { %1338 = vmatprep.subr.bf16.mxu1 %v1562_v1 }
 0x2d4   : > { %1339 = vmatpush3.bf16.msra.mxu1 %v1476_v7 }
 0x2d5   : > { %1340 = vmatprep.subr.bf16.mxu1 %v1562_v1 }
 0x2d8   : > { %1341 = vmatpush3.bf16.msra.mxu1 %v1477_v8 }
 0x2db   : > { %1343 = vmatmul.mubr.bf16.vlgmr.msra.gmra.mrb[8].mxu1 %v593_v0 }
 0x38e   : > { %v698_v11 = vpop.f32.mrb[4].mxu1  ;;  %v805_v12 = vpop.f32.mrb[8].mxu0 }
 0x38f   : > { %v705_v13 = vmul.f32 %v704_v9, %v698_v11  ;;  %v812_v14 = vmul.f32 %v811_v10, %v805_v12  ;;  %v1304_v15 = vpop.f32.mrb[5].mxu1  ;;  %v1324_v16 = vpop.f32.mrb[9].mxu0 }
 0x390   : > { %v701_v17 = vpop.f32.mrb[6].mxu1  ;;  %v808_v18 = vpop.f32.mrb[10].mxu0 }
 0x391   : > { %v813_v19 = vadd.f32 %v812_v14, %v705_v13  ;;  %v1305_v20 = vpop.f32.mrb[7].mxu1  ;;  %v1325_v21 = vpop.f32.mrb[11].mxu0 }
 0x3ae   : > { %v913_v23 = vpop.f32.mrb[8].mxu1 }
 0x3af   : > { %v920_v24 = vmul.f32 %v919_v22, %v913_v23  ;;  %v1344_v1 = vpop.f32.mrb[9].mxu1 }
 0x3b0   : > { %v916_v26 = vpop.f32.mrb[10].mxu1 }
 0x3b1   : > { %v921_v27 = vadd.f32 %v920_v24, %v813_v19  ;;  %v1345_v28 = vpop.f32.mrb[11].mxu1 }
 0x3b3   : > { %v929_v29 = vadd.f32 %v1139_v25, %v921_v27 }
 0x3b5   : > { %930 = vst.msk [vmem:[%s339_s23] sm:$0xff] %vm387_vm1, %v929_v29 }
 0x3b6   : > { %1495 = shalt.err (!%p1492_p5)
}
 0x3b7   : > { %s1496_s18 = scalar_lea.hbm %s1848_s12, 128  ;;  %s1500_s22 = scalar_lea.hbm %s1903_s7, 256 }
 0x3b8   : > { %p1497_p6 = scmp.ne.s32.totalorder %s1848_s12, %s1496_s18  ;;  %p1501_p10 = scmp.lt.u32.totalorder %s1848_s12, %s1903_s7 }
 0x3b9   : > { %p1502_p11 = scmp.lt.u32.totalorder %s1500_s22, %s1496_s18  ;;  %p1504_p13 = scmp.lt.u32.totalorder %s1496_s18, %s1848_s12 }
 0x3ba   : > { %p1498_p7 = pnand %p1497_p6, %p1646_p4 }
 0x3bb   : > { %p1503_p12 = por %p1502_p11, %p1501_p10 }
 0x3bc   : > { %p1499_p9 = pneg %p1498_p7 }
 0x3bd   : > { %p1505_p0 = por %p1504_p13, %p1503_p12 }
 0x3bf   : > { %p1506_p1 = pnand %p1505_p0, %p1499_p9 }
 0x3c1   : > { %1509 = shalt.err (!%p1506_p1)
}
 0x3c2   : > { %1394 = dma.vmem_to_hbm [thread:$0]  (%p1646_p4), %s1850_s30, 128, %s1848_s12, %s932_s16  }
 0x3c3 PF: > { %p1400_p2 = scmp.ge.s32.totalorder %s1560_s29, 2  ;;  %s958_s10 = sand.u32 1, %s1540_s24  }
 0x3c4   : > { %s959_s17 = scalar_lea.sflag [#allocation4], %s958_s10 }
 0x3c5   : > { %p1397_p3 = pnand %p1400_p2, %p1653_p8 }
 0x3c7   : > { %1535 = dma.done.wait (!%p1397_p3), %s959_s17, 128  }
 0x3c8   : > { %1537 = vsyncadd (!%p1397_p3), %s959_s17, 4294967168  ;;  %s20_s29 = sadd.s32 1, %s1560_s29   ;;  %s1906_s24 = smov %s1544_s25 }
 0x3c9   : > { %p17_p5 = scmp.ge.s32.totalorder %s20_s29, 4   ;;  %s1907_s25 = smov %s1548_s26 }
 0x3ca   : > { %s1908_s26 = smov %s1659_s14  ;;  %s1909_s27 = smov %s1556_s28 }
 0x3cb   : > { %s1910_s28 = smov %s1912_s9  ;;  %19 = sbr.rel (!%p17_p5) target bundleno = 4 (0x4), region = 97 }
 0x3d2   :  { %964 = vsyncpa [#allocation4], 1 }
 0x3d3   :  { %966 = vsyncpa [#allocation4 + $0x1], 1 }

</bundles_post_ra>
